<compile_context>
chip_gen: v5e
topology: v5e:2x2
jax: 0.10.0
libtpu: 0.0.40
codegen_flags: <defaults>
</compile_context>

<pallas_src>
from functools import partial

import jax
import jax.numpy as jnp
from jax import lax
from jax.experimental import pallas as pl
from jax.experimental.pallas import tpu as pltpu


def _round_up(x: int, m: int) -> int:
    return ((x + m - 1) // m) * m


def _cdiv(a: int, b: int) -> int:
    return -(-a // b)


def _dot_xt_w(x, w, precision):
    # x: (tm, tk), w: (tn, tk) -> contract both over their last (K) axis,
    # i.e. x @ w.T, without materializing a transpose anywhere.
    return lax.dot_general(
        x, w,
        dimension_numbers=(((1,), (1,)), ((), ())),
        preferred_element_type=jnp.float32,
        precision=precision)


# ---------------- f32 output: accumulate directly into the resident o_ref ----

def _fc_f32_bias_kernel(x_ref, w_ref, b_ref, o_ref, *, precision):
    k = pl.program_id(2)

    @pl.when(k == 0)
    def _():
        # Bias applied exactly once, as the accumulator init.
        o_ref[...] = jnp.broadcast_to(b_ref[...], o_ref.shape)

    o_ref[...] += _dot_xt_w(x_ref[...], w_ref[...], precision)


def _fc_f32_nobias_kernel(x_ref, w_ref, o_ref, *, precision):
    k = pl.program_id(2)

    @pl.when(k == 0)
    def _():
        o_ref[...] = jnp.zeros_like(o_ref)

    o_ref[...] += _dot_xt_w(x_ref[...], w_ref[...], precision)


# ---------------- non-f32 output: f32 VMEM scratch accumulator ---------------

def _fc_acc_bias_kernel(x_ref, w_ref, b_ref, o_ref, acc_ref, *, precision):
    k = pl.program_id(2)

    @pl.when(k == 0)
    def _():
        acc_ref[...] = jnp.zeros_like(acc_ref)

    acc_ref[...] += _dot_xt_w(x_ref[...], w_ref[...], precision)

    @pl.when(k == pl.num_programs(2) - 1)
    def _():
        o_ref[...] = (acc_ref[...] + b_ref[...]).astype(o_ref.dtype)


def _fc_acc_nobias_kernel(x_ref, w_ref, o_ref, acc_ref, *, precision):
    k = pl.program_id(2)

    @pl.when(k == 0)
    def _():
        acc_ref[...] = jnp.zeros_like(acc_ref)

    acc_ref[...] += _dot_xt_w(x_ref[...], w_ref[...], precision)

    @pl.when(k == pl.num_programs(2) - 1)
    def _():
        o_ref[...] = acc_ref[...].astype(o_ref.dtype)


def fc_forward(x, weight, bias=None, *, tm_cap=512, tn_cap=512, tk_cap=2048,
               precision=None):
    """Equivalent of the PyTorch `Fc` module forward (nn.Linear).

    Args:
      x:      (batch, in_features)
      weight: (out_features, in_features)  -- PyTorch convention, NOT transposed
      bias:   (out_features,) or None
    Returns:
      (batch, out_features), dtype of x.
    """
    batch, in_f = x.shape
    out_f, in_f_w = weight.shape
    assert in_f == in_f_w, (x.shape, weight.shape)

    # ---- Tile selection (sublane-aligned M, lane-dense N, K minimizing pad).
    tm = min(tm_cap, _round_up(batch, 8))
    tn = min(tn_cap, _round_up(out_f, 128))

    k128 = _round_up(in_f, 128)
    if k128 <= tk_cap:
        tk = k128
    else:
        ksteps = _cdiv(k128, tk_cap)
        tk = _round_up(_cdiv(k128, ksteps), 128)
    K_pad = _round_up(in_f, tk)

    gm, gn = _cdiv(batch, tm), _cdiv(out_f, tn)
    # Megacore (v7x): make sure the parallel (i, j) grid has >= 2 tiles when
    # the problem is big enough to care; small problems stay single-tile.
    if gm * gn == 1 and batch * out_f >= 128 * 256:
        if out_f > 128:
            tn = max(128, _round_up(tn // 2, 128))
        elif batch > 8:
            tm = max(8, _round_up(tm // 2, 8))
        gm, gn = _cdiv(batch, tm), _cdiv(out_f, tn)

    gk = K_pad // tk
    grid = (gm, gn, gk)

    # ---- Only K is padded (must be real zeros for the reduction).
    # M/N edge blocks are clipped by Pallas; garbage only lands in masked-out
    # output rows/cols, so no padded weight/output is ever materialized in HBM.
    if K_pad != in_f:
        x_p = jnp.pad(x, ((0, 0), (0, K_pad - in_f)))
        w_p = jnp.pad(weight, ((0, 0), (0, K_pad - in_f)))
    else:
        x_p, w_p = x, weight

    x_spec = pl.BlockSpec((tm, tk), lambda i, j, k: (i, k))
    w_spec = pl.BlockSpec((tn, tk), lambda i, j, k: (j, k))
    b_spec = pl.BlockSpec((1, tn), lambda i, j, k: (0, j))
    o_spec = pl.BlockSpec((tm, tn), lambda i, j, k: (i, j))

    out_shape = jax.ShapeDtypeStruct((batch, out_f), x.dtype)
    itemsize = jnp.dtype(x.dtype).itemsize
    cost = pl.CostEstimate(
        flops=2 * batch * out_f * K_pad,
        transcendentals=0,
        bytes_accessed=(batch * K_pad * gn + out_f * K_pad * gm) * itemsize
                       + batch * out_f * itemsize
                       + (out_f * 4 if bias is not None else 0),
    )
    compiler_params = pltpu.CompilerParams(
        dimension_semantics=("parallel", "parallel", "arbitrary"),
        vmem_limit_bytes=48 * 1024 * 1024,  # worst-case tiles ~18 MiB; v7x-safe
    )

    direct_f32 = (x.dtype == jnp.float32)
    if direct_f32:
        scratch = []
        kernel = _fc_f32_bias_kernel if bias is not None else _fc_f32_nobias_kernel
    else:
        scratch = [pltpu.VMEM((tm, tn), jnp.float32)]
        kernel = _fc_acc_bias_kernel if bias is not None else _fc_acc_nobias_kernel
    kernel = partial(kernel, precision=precision)

    in_specs = [x_spec, w_spec]
    args = [x_p, w_p]
    if bias is not None:
        in_specs.append(b_spec)
        args.append(bias.reshape(1, out_f).astype(jnp.float32))

    return pl.pallas_call(
        kernel,
        out_shape=out_shape,
        grid_spec=pltpu.PrefetchScalarGridSpec(
            num_scalar_prefetch=0,
            grid=grid,
            in_specs=in_specs,
            out_specs=o_spec,
            scratch_shapes=scratch),
        compiler_params=compiler_params,
        cost_estimate=cost,
    )(*args)


if __name__ == "__main__":
    key = jax.random.PRNGKey(0)
    kx, kw, kb, kx2, kw2, kb2, kx3, kw3, kb3 = jax.random.split(key, 9)

    fc = jax.jit(fc_forward)

    # --- Small shapes consistent with the module (single tile, f32 direct path).
    batch, in_f, out_f = 8, 32, 64
    x = jax.random.normal(kx, (batch, in_f), dtype=jnp.float32)
    bound = 1.0 / (in_f ** 0.5)
    w = jax.random.uniform(kw, (out_f, in_f), jnp.float32, -bound, bound)
    b = jax.random.uniform(kb, (out_f,), jnp.float32, -bound, bound)
    y = fc(x, w, b)
    jax.block_until_ready(y)
    assert y.shape == (batch, out_f)
    assert jnp.allclose(y, x @ w.T + b, atol=1e-4, rtol=1e-4), "small-shape mismatch"

    # --- Larger shape: multi-step K reduction, K zero-pad (3000 -> 3072),
    #     unaligned out_features handled by N edge-block clipping, and the
    #     megacore tile split (tn 384 -> 256 -> 2 N-tiles).
    batch2, in2, out2 = 192, 3000, 320
    x2 = jax.random.normal(kx2, (batch2, in2), dtype=jnp.float32)
    bound2 = 1.0 / (in2 ** 0.5)
    w2 = jax.random.uniform(kw2, (out2, in2), jnp.float32, -bound2, bound2)
    b2 = jax.random.uniform(kb2, (out2,), jnp.float32, -bound2, bound2)
    y2 = fc(x2, w2, b2)
    jax.block_until_ready(y2)
    assert y2.shape == (batch2, out2)
    # Looser tolerance: default-precision f32 dots run as multi-pass bf16 on the MXU.
    assert jnp.allclose(y2, x2 @ w2.T + b2, atol=2e-2, rtol=2e-2), "tiled-shape mismatch"

    # --- No-bias path.
    y3 = fc_forward(x, w, None)
    jax.block_until_ready(y3)
    assert jnp.allclose(y3, x @ w.T, atol=1e-4, rtol=1e-4), "no-bias mismatch"

    # --- bf16 inputs/outputs: exercises the f32 scratch-accumulator path.
    batch3, in3, out3 = 16, 256, 128
    x3 = jax.random.normal(kx3, (batch3, in3), dtype=jnp.float32).astype(jnp.bfloat16)
    bound3 = 1.0 / (in3 ** 0.5)
    w3 = jax.random.uniform(kw3, (out3, in3), jnp.float32,
                            -bound3, bound3).astype(jnp.bfloat16)
    b3 = jax.random.uniform(kb3, (out3,), jnp.float32, -bound3, bound3)
    y4 = fc(x3, w3, b3)
    jax.block_until_ready(y4)
    ref4 = x3.astype(jnp.float32) @ w3.astype(jnp.float32).T + b3
    assert y4.dtype == jnp.bfloat16
    assert jnp.allclose(y4.astype(jnp.float32), ref4, atol=3e-2, rtol=3e-2), "bf16 mismatch"

    print("KERNEL_OK")
</pallas_src>

<mosaic_0001>
module attributes {stable_mosaic.version = 11 : i64} {
  func.func @_fc_f32_bias_kernel(%arg0: i32, %arg1: i32, %arg2: i32, %arg3: memref<8x128xf32, #tpu.memory_space<vmem>>, %arg4: memref<128x128xf32, #tpu.memory_space<vmem>>, %arg5: memref<1x128xf32, #tpu.memory_space<vmem>>, %arg6: memref<8x128xf32, #tpu.memory_space<vmem>>) attributes {dimension_semantics = [#tpu.dimension_semantics<parallel>, #tpu.dimension_semantics<parallel>, #tpu.dimension_semantics<arbitrary>], iteration_bounds = array<i64: 1, 1, 1>, scalar_prefetch = 0 : i64, scratch_operands = 0 : i64, tpu.core_type = #tpu.core_type<tc>, window_params = [{transform_indices = @transform_0, window_bounds = array<i64: 8, 128>}, {transform_indices = @transform_1, window_bounds = array<i64: 128, 128>}, {transform_indices = @transform_2, window_bounds = array<i64: 1, 128>}, {transform_indices = @transform_3, window_bounds = array<i64: 8, 128>}]} {
    %c0_i32 = arith.constant 0 : i32
    %0 = arith.cmpi eq, %arg2, %c0_i32 : i32
    %1 = arith.extui %0 : i1 to i32
    %c0_i32_0 = arith.constant 0 : i32
    %2 = arith.cmpi ne, %1, %c0_i32_0 : i32
    scf.if %2 {
      %c0_8 = arith.constant 0 : index
      %c0_9 = arith.constant 0 : index
      %9 = vector.load %arg5[%c0_8, %c0_9] : memref<1x128xf32, #tpu.memory_space<vmem>>, vector<1x128xf32>
      %10 = vector.shape_cast %9 : vector<1x128xf32> to vector<1x128xf32>
      %11 = vector.broadcast %10 : vector<1x128xf32> to vector<8x128xf32>
      %c0_10 = arith.constant 0 : index
      %c0_11 = arith.constant 0 : index
      %12 = vector.load %arg6[%c0_10, %c0_11] : memref<8x128xf32, #tpu.memory_space<vmem>>, vector<8x128xf32>
      tpu.vector_store %arg6[%c0_10, %c0_11], %11 {strides = array<i32>} : memref<8x128xf32, #tpu.memory_space<vmem>>, vector<8x128xf32>,
    } else {
    }
    %c0 = arith.constant 0 : index
    %c0_1 = arith.constant 0 : index
    %3 = vector.load %arg6[%c0, %c0_1] : memref<8x128xf32, #tpu.memory_space<vmem>>, vector<8x128xf32>
    %c0_2 = arith.constant 0 : index
    %c0_3 = arith.constant 0 : index
    %4 = vector.load %arg3[%c0_2, %c0_3] : memref<8x128xf32, #tpu.memory_space<vmem>>, vector<8x128xf32>
    %c0_4 = arith.constant 0 : index
    %c0_5 = arith.constant 0 : index
    %5 = vector.load %arg4[%c0_4, %c0_5] : memref<128x128xf32, #tpu.memory_space<vmem>>, vector<128x128xf32>
    %cst = arith.constant dense<0.000000e+00> : vector<8x128xf32>
    %6 = tpu.matmul %4, %5, %cst {dimension_numbers = #tpu.dot_dimension_numbers<[1], [1], [0], [0], [0, 0, 1, 0], [], []>} : vector<8x128xf32>, vector<128x128xf32>, vector<8x128xf32> -> vector<8x128xf32>
    %7 = arith.addf %3, %6 : vector<8x128xf32>
    %c0_6 = arith.constant 0 : index
    %c0_7 = arith.constant 0 : index
    %8 = vector.load %arg6[%c0_6, %c0_7] : memref<8x128xf32, #tpu.memory_space<vmem>>, vector<8x128xf32>
    tpu.vector_store %arg6[%c0_6, %c0_7], %7 {strides = array<i32>} : memref<8x128xf32, #tpu.memory_space<vmem>>, vector<8x128xf32>,
    return
  }
  func.func @transform_0(%arg0: i32, %arg1: i32, %arg2: i32) -> (i32, i32) {
    %c0_i32 = arith.constant 0 : i32
    return %arg0, %arg2 : i32, i32
  }
  func.func @transform_1(%arg0: i32, %arg1: i32, %arg2: i32) -> (i32, i32) {
    %c0_i32 = arith.constant 0 : i32
    return %arg1, %arg2 : i32, i32
  }
  func.func @transform_2(%arg0: i32, %arg1: i32, %arg2: i32) -> (i32, i32) {
    %c0_i32 = arith.constant 0 : i32
    %c0_i32_0 = arith.constant 0 : i32
    return %c0_i32, %arg1 : i32, i32
  }
  func.func @transform_3(%arg0: i32, %arg1: i32, %arg2: i32) -> (i32, i32) {
    %c0_i32 = arith.constant 0 : i32
    return %arg0, %arg1 : i32, i32
  }
}

</mosaic_0001>

<bundles_post_ra>
// kernel: fc_forward.1
= control target key start
LH: loop header
LB: loop body
LE: loop exit
PB: predicated region body
PF: predicated region fallthrough
CT: control target
= control target key end

     0   :  { %s186_s0 = inlined_call_operand.vmem [shape: f32[8,128], index: 0, kind: input, shape index: {}]   ;;  %s187_s1 = inlined_call_operand.vmem [shape: f32[64,128], index: 1, kind: input, shape index: {}]   ;;  %s188_s2 = inlined_call_operand.vmem [shape: f32[1,64], index: 2, kind: input, shape index: {}]   ;;  %s189_s3 = inlined_call_operand.hbm [shape: f32[8,64], index: 3, kind: output, shape index: {}]  }
   0x1   :  { %v41_v0 = vld [vmem:[%s187_s1 + $0x78] sm:$0xff]  ;;  %v40_v1 = vld [vmem:[%s187_s1 + $0x70] sm:$0xff] }
   0x2   :  { %42 = vmatpush.xpose.msra.mxu0 %v41_v0 }
   0x3   :  { %8 = vsyncpa [#allocation3], 0  ;;  %v39_v2 = vld [vmem:[%s187_s1 + $0x68] sm:$0xff]  ;;  %v38_v3 = vld [vmem:[%s187_s1 + $0x60] sm:$0xff]  ;;  %s108_s21 = smov [#allocation2]   ;;  %s71_s25 = sshll.u32 %s189_s3, 4  ;;  %s72_s25 = int_to_ptr.hbm [resolvable:$true] %s71_s25 }
   0x4   :  { %v37_v4 = vld [vmem:[%s187_s1 + $0x58] sm:$0xff]  ;;  %v36_v5 = vld [vmem:[%s187_s1 + $0x50] sm:$0xff]  ;;  %v35_v6 = vld [vmem:[%s187_s1 + $0x48] sm:$0xff]  ;;  %s69_s22 = sshll.u32 %s108_s21, 4  ;;  %s70_s22 = int_to_ptr.vmem [resolvable:$true] %s69_s22 }
   0x5   :  { %v34_v7 = vld [vmem:[%s187_s1 + $0x40] sm:$0xff]  ;;  %v33_v8 = vld [vmem:[%s187_s1 + $0x38] sm:$0xff]  ;;  %v32_v9 = vld [vmem:[%s187_s1 + $0x30] sm:$0xff] }
   0x6   :  { %43 = vmatpush.xpose.msra.mxu0 %v40_v1  ;;  %v31_v10 = vld [vmem:[%s187_s1 + $0x28] sm:$0xff]  ;;  %v30_v11 = vld [vmem:[%s187_s1 + $0x20] sm:$0xff]  ;;  %v29_v12 = vld [vmem:[%s187_s1 + $0x18] sm:$0xff] }
   0x7   :  { %v28_v13 = vld [vmem:[%s187_s1 + $0x10] sm:$0xff]  ;;  %v27_v14 = vld [vmem:[%s187_s1 + $0x8] sm:$0xff]  ;;  %v26_v15 = vld [vmem:[%s187_s1] sm:$0xff] }
   0x8   :  { %v25_v16 = vld [vmem:[%s186_s0] sm:$0xff] }
   0x9   :  { %v81_v17 = vld [vmem:[%s188_s2] ss:$0 sm:$0xff] }
   0xa   :  { %44 = vmatpush.xpose.msra.mxu0 %v39_v2 }
   0xe   :  { %45 = vmatpush.xpose.msra.mxu0 %v38_v3 }
  0x12   :  { %46 = vmatpush.xpose.msra.mxu0 %v37_v4 }
  0x16   :  { %47 = vmatpush.xpose.msra.mxu0 %v36_v5 }
  0x1a   :  { %48 = vmatpush.xpose.msra.mxu0 %v35_v6 }
  0x1e   :  { %49 = vmatpush.xpose.msra.mxu0 %v34_v7 }
  0x22   :  { %50 = vmatpush.xpose.msra.mxu0 %v33_v8 }
  0x26   :  { %51 = vmatpush.xpose.msra.mxu0 %v32_v9 }
  0x2a   :  { %52 = vmatpush.xpose.msra.mxu0 %v31_v10 }
  0x2e   :  { %53 = vmatpush.xpose.msra.mxu0 %v30_v11 }
  0x32   :  { %54 = vmatpush.xpose.msra.mxu0 %v29_v12 }
  0x36   :  { %55 = vmatpush.xpose.msra.mxu0 %v28_v13 }
  0x3a   :  { %56 = vmatpush.xpose.msra.mxu0 %v27_v14 }
  0x3e   :  { %57 = vmatpush.xpose.msra.mxu0 %v26_v15 }
  0x41   :  { %58 = vmatmul.f32.vlgmr.msra.gmra.mxu0 %v25_v16 }
  0xbe   :  { %v59_v18 = vpop.f32.mrf.mxu0 }
  0xbf   :  { %v62_v19 = vadd.f32 %v81_v17, %v59_v18 }
  0xc1   :  { %63 = vst [vmem:[#allocation2] sm:$0xff] %v62_v19 }
  0xc2   :  { %74 = dma.vmem_to_hbm [thread:$0]  %s70_s22, 128, %s72_s25, [#allocation3]  }
  0xc3   :  { %106 = dma.done.wait [#allocation3], 128  }
  0xc4   :  { %107 = vsyncadd [#allocation3], 4294967168 }
  0xc5   :  { %79 = vsyncpa [#allocation3], 1 }

</bundles_post_ra>
